<compile_context>
chip_gen: v7x
topology: tpu7x:2x2x1
jax: 0.10.0
libtpu: 0.0.40
codegen_flags: <defaults>
</compile_context>

<pallas_src>
import functools

import jax
import jax.numpy as jnp
from jax.experimental import pallas as pl
from jax.experimental.pallas import tpu as pltpu

_LANES = 128
_SUBLANES = 8
# 8192 rows x 128 lanes x 4 B = 4 MiB per input block; x2 inputs x2 pipeline
# buffers = 16 MiB of VMEM -> fits v5e/v6e (128 MiB) and v7x (64 MiB) with
# headroom while amortizing per-step overhead.
_MAX_TILE_ROWS = 8192


def _soft_iou_kernel(logits_ref, targets_ref, out_ref,
                     inter_acc, p_acc, t_acc, *,
                     rows_raw, tile_rows, chunks_per_split, need_mask):
    k = pl.program_id(2)

    @pl.when(k == 0)
    def _init():
        inter_acc[...] = jnp.zeros_like(inter_acc)
        p_acc[...] = jnp.zeros_like(p_acc)
        t_acc[...] = jnp.zeros_like(t_acc)

    # Block is (1, tile_rows, 128); index the leading axis for a dense 2D tile.
    logits = logits_ref[0].astype(jnp.float32)      # (tile_rows, 128)
    targets = targets_ref[0].astype(jnp.float32)    # (tile_rows, 128)

    # Single-transcendental sigmoid: 0.5*(tanh(0.5*x)+1) == sigmoid(x).
    # Halves EUP pressure vs exp+reciprocal; exact 0 for padded -1e9 logits.
    probs = 0.5 * (jnp.tanh(0.5 * logits) + 1.0)

    if need_mask:
        # Ragged / overshooting chunks: zero out rows past the valid extent.
        s = pl.program_id(1)
        g = s * chunks_per_split + k                      # global chunk index
        rows_valid = jnp.clip(rows_raw - g * tile_rows, 0, tile_rows)
        row_ids = jax.lax.broadcasted_iota(jnp.int32, (tile_rows, _LANES), 0)
        mask = row_ids < rows_valid
        probs = jnp.where(mask, probs, 0.0)
        targets = jnp.where(mask, targets, 0.0)

    # Per-chunk sublane reductions into persistent (1, 128) lane accumulators;
    # the cross-lane collapse happens once, in the (tiny) JAX wrapper.
    inter_acc[...] += jnp.sum(probs * targets, axis=0, keepdims=True)
    p_acc[...] += jnp.sum(probs, axis=0, keepdims=True)
    t_acc[...] += jnp.sum(targets, axis=0, keepdims=True)

    @pl.when(k == pl.num_programs(2) - 1)
    def _finalize():
        # Lane-dense (8, 128) output block: sublane 0 = intersection partials,
        # sublane 1 = sum(probs) partials, sublane 2 = sum(targets) partials.
        block = jnp.concatenate(
            [inter_acc[...], p_acc[...], t_acc[...],
             jnp.zeros((_SUBLANES - 3, _LANES), jnp.float32)], axis=0)
        out_ref[...] = block[None, None]


def soft_iou_loss(logits, targets, smooth=1e-05):
    """Pallas implementation of SoftIOULoss.forward.

    logits, targets: (B, C, H, W) arrays (NCHW). Returns a scalar float32.
    """
    B = logits.shape[0]
    l2 = logits.reshape(B, -1)
    t2 = targets.reshape(B, -1)
    N = l2.shape[1]

    # Lane-alignment fallback only: pad to a multiple of 128 when needed.
    # sigmoid(-1e9) == 0 (also with the tanh form), target pad of 0 is inert.
    rem = N % _LANES
    if rem:
        pad = _LANES - rem
        l2 = jnp.pad(l2, ((0, 0), (0, pad)), constant_values=-1e9)
        t2 = jnp.pad(t2, ((0, 0), (0, pad)), constant_values=0.0)
    rows_raw = l2.shape[1] // _LANES

    # Lane-dense layout: fold N into (rows, 128) so small B doesn't waste
    # sublanes.  This reshape is a free view (no HBM copy).
    l3 = l2.reshape(B, rows_raw, _LANES)
    t3 = t2.reshape(B, rows_raw, _LANES)

    if rows_raw <= _MAX_TILE_ROWS:
        tile_rows = rows_raw          # full-dim block, no row padding needed
        num_chunks = 1
    else:
        tile_rows = _MAX_TILE_ROWS    # multiple of 8; ragged tail masked
        num_chunks = pl.cdiv(rows_raw, tile_rows)

    # When the batch alone can't occupy both TensorCores of a megacore chip
    # (v7x), split the reduction across a second parallel axis; harmless on
    # single-TC chips.
    n_split = 2 if (B == 1 and num_chunks >= 2) else 1
    cps = pl.cdiv(num_chunks, n_split)          # chunks per split

    need_mask = (n_split * cps * tile_rows) != rows_raw
    last_chunk = num_chunks - 1
    overshoot = n_split * cps > num_chunks

    if overshoot:
        def in_map(b, s, k):
            return (b, jnp.minimum(s * cps + k, last_chunk), 0)
    else:
        def in_map(b, s, k):
            return (b, s * cps + k, 0)

    kernel = functools.partial(
        _soft_iou_kernel,
        rows_raw=rows_raw, tile_rows=tile_rows,
        chunks_per_split=cps, need_mask=need_mask)

    in_bytes = (jnp.dtype(l3.dtype).itemsize + jnp.dtype(t3.dtype).itemsize)
    cost = pl.CostEstimate(
        flops=8 * B * rows_raw * _LANES,
        transcendentals=B * rows_raw * _LANES,
        bytes_accessed=B * rows_raw * _LANES * in_bytes
        + B * n_split * _SUBLANES * _LANES * 4,
    )

    out = pl.pallas_call(
        kernel,
        out_shape=jax.ShapeDtypeStruct(
            (B, n_split, _SUBLANES, _LANES), jnp.float32),
        grid=(B, n_split, cps),
        in_specs=[
            pl.BlockSpec((1, tile_rows, _LANES), in_map),
            pl.BlockSpec((1, tile_rows, _LANES), in_map),
        ],
        out_specs=pl.BlockSpec((1, 1, _SUBLANES, _LANES),
                               lambda b, s, k: (b, s, 0, 0)),
        scratch_shapes=[
            pltpu.VMEM((1, _LANES), jnp.float32),   # intersection partials
            pltpu.VMEM((1, _LANES), jnp.float32),   # sum(probs) partials
            pltpu.VMEM((1, _LANES), jnp.float32),   # sum(targets) partials
        ],
        compiler_params=pltpu.CompilerParams(
            # batch + split axes parallel (megacore sharding on v7x),
            # reduction axis last and arbitrary (sequential accumulation).
            dimension_semantics=("parallel", "parallel", "arbitrary"),
            vmem_limit_bytes=32 * 1024 * 1024,
        ),
        cost_estimate=cost,
    )(l3, t3)

    # Tiny wrapper reduction: collapse lanes + splits, then IoU and mean.
    sums = jnp.sum(out, axis=(1, 3))              # (B, 8)
    inter = sums[:, 0]
    union = sums[:, 1] + sums[:, 2] - inter
    iou = (inter + smooth) / (union + smooth)
    return 1.0 - jnp.mean(iou)


def soft_iou_loss_ref(logits, targets, smooth=1e-05):
    """Pure-JAX reference mirroring the PyTorch forward."""
    B = logits.shape[0]
    probs = jax.nn.sigmoid(logits.astype(jnp.float32)).reshape(B, -1)
    t = targets.astype(jnp.float32).reshape(B, -1)
    inter = jnp.sum(probs * t, axis=1)
    union = jnp.sum(probs, axis=1) + jnp.sum(t, axis=1) - inter
    iou = (inter + smooth) / (union + smooth)
    return 1.0 - jnp.mean(iou)


if __name__ == "__main__":
    key = jax.random.PRNGKey(0)
    k_logits, k_targets = jax.random.split(key)

    B, C, H, W = 2, 4, 16, 16
    logits = jax.random.normal(k_logits, (B, C, H, W), dtype=jnp.float32)
    # Binary targets, like segmentation masks.
    targets = (jax.random.uniform(k_targets, (B, C, H, W)) > 0.5).astype(
        jnp.float32
    )

    loss = jax.block_until_ready(soft_iou_loss(logits, targets))
    ref = jax.block_until_ready(soft_iou_loss_ref(logits, targets))
    assert jnp.allclose(loss, ref, atol=1e-5, rtol=1e-5), (loss, ref)

    print("KERNEL_OK")
</pallas_src>

<mosaic_0001>
module attributes {stable_mosaic.version = 11 : i64} {
  func.func @_soft_iou_kernel(%arg0: i32, %arg1: i32, %arg2: i32, %arg3: memref<1x8x128xf32, #tpu.memory_space<vmem>>, %arg4: memref<1x8x128xf32, #tpu.memory_space<vmem>>, %arg5: memref<1x1x8x128xf32, #tpu.memory_space<vmem>>, %arg6: memref<1x128xf32, #tpu.memory_space<vmem>>, %arg7: memref<1x128xf32, #tpu.memory_space<vmem>>, %arg8: memref<1x128xf32, #tpu.memory_space<vmem>>) attributes {dimension_semantics = [#tpu.dimension_semantics<parallel>, #tpu.dimension_semantics<parallel>, #tpu.dimension_semantics<arbitrary>], iteration_bounds = array<i64: 2, 1, 1>, scalar_prefetch = 0 : i64, scratch_operands = 3 : i64, tpu.core_type = #tpu.core_type<tc>, window_params = [{transform_indices = @transform_0, window_bounds = array<i64: 1, 8, 128>}, {transform_indices = @transform_1, window_bounds = array<i64: 1, 8, 128>}, {transform_indices = @transform_2, window_bounds = array<i64: 1, 1, 8, 128>}]} {
    %c0_i32 = arith.constant 0 : i32
    %0 = arith.cmpi eq, %arg2, %c0_i32 : i32
    %1 = arith.extui %0 : i1 to i32
    %c0_i32_0 = arith.constant 0 : i32
    %2 = arith.cmpi ne, %1, %c0_i32_0 : i32
    scf.if %2 {
      %cst_25 = arith.constant 0.000000e+00 : f32
      %33 = vector.broadcast %cst_25 : f32 to vector<1x128xf32>
      %c0_26 = arith.constant 0 : index
      %c0_27 = arith.constant 0 : index
      %34 = vector.load %arg6[%c0_26, %c0_27] : memref<1x128xf32, #tpu.memory_space<vmem>>, vector<1x128xf32>
      tpu.vector_store %arg6[%c0_26, %c0_27], %33 {strides = array<i32>} : memref<1x128xf32, #tpu.memory_space<vmem>>, vector<1x128xf32>,
      %cst_28 = arith.constant 0.000000e+00 : f32
      %35 = vector.broadcast %cst_28 : f32 to vector<1x128xf32>
      %c0_29 = arith.constant 0 : index
      %c0_30 = arith.constant 0 : index
      %36 = vector.load %arg7[%c0_29, %c0_30] : memref<1x128xf32, #tpu.memory_space<vmem>>, vector<1x128xf32>
      tpu.vector_store %arg7[%c0_29, %c0_30], %35 {strides = array<i32>} : memref<1x128xf32, #tpu.memory_space<vmem>>, vector<1x128xf32>,
      %cst_31 = arith.constant 0.000000e+00 : f32
      %37 = vector.broadcast %cst_31 : f32 to vector<1x128xf32>
      %c0_32 = arith.constant 0 : index
      %c0_33 = arith.constant 0 : index
      %38 = vector.load %arg8[%c0_32, %c0_33] : memref<1x128xf32, #tpu.memory_space<vmem>>, vector<1x128xf32>
      tpu.vector_store %arg8[%c0_32, %c0_33], %37 {strides = array<i32>} : memref<1x128xf32, #tpu.memory_space<vmem>>, vector<1x128xf32>,
    } else {
    }
    %c0 = arith.constant 0 : index
    %c0_1 = arith.constant 0 : index
    %c0_2 = arith.constant 0 : index
    %3 = vector.load %arg3[%c0, %c0_1, %c0_2] : memref<1x8x128xf32, #tpu.memory_space<vmem>>, vector<1x8x128xf32>
    %4 = vector.shape_cast %3 : vector<1x8x128xf32> to vector<8x128xf32>
    %c0_3 = arith.constant 0 : index
    %c0_4 = arith.constant 0 : index
    %c0_5 = arith.constant 0 : index
    %5 = vector.load %arg4[%c0_3, %c0_4, %c0_5] : memref<1x8x128xf32, #tpu.memory_space<vmem>>, vector<1x8x128xf32>
    %6 = vector.shape_cast %5 : vector<1x8x128xf32> to vector<8x128xf32>
    %cst = arith.constant 5.000000e-01 : f32
    %7 = vector.broadcast %cst : f32 to vector<8x128xf32>
    %8 = arith.mulf %7, %4 : vector<8x128xf32>
    %9 = math.tanh %8 : vector<8x128xf32>
    %cst_6 = arith.constant 1.000000e+00 : f32
    %10 = vector.broadcast %cst_6 : f32 to vector<8x128xf32>
    %11 = arith.addf %9, %10 : vector<8x128xf32>
    %cst_7 = arith.constant 5.000000e-01 : f32
    %12 = vector.broadcast %cst_7 : f32 to vector<8x128xf32>
    %13 = arith.mulf %12, %11 : vector<8x128xf32>
    %c0_8 = arith.constant 0 : index
    %c0_9 = arith.constant 0 : index
    %14 = vector.load %arg6[%c0_8, %c0_9] : memref<1x128xf32, #tpu.memory_space<vmem>>, vector<1x128xf32>
    %15 = arith.mulf %13, %6 : vector<8x128xf32>
    %cst_10 = arith.constant dense<0.000000e+00> : vector<128xf32>
    %16 = vector.multi_reduction <add>, %15, %cst_10 [0] : vector<8x128xf32> to vector<128xf32>
    %17 = vector.shape_cast %16 : vector<128xf32> to vector<1x128xf32>
    %18 = arith.addf %14, %17 : vector<1x128xf32>
    %c0_11 = arith.constant 0 : index
    %c0_12 = arith.constant 0 : index
    %19 = vector.load %arg6[%c0_11, %c0_12] : memref<1x128xf32, #tpu.memory_space<vmem>>, vector<1x128xf32>
    tpu.vector_store %arg6[%c0_11, %c0_12], %18 {strides = array<i32>} : memref<1x128xf32, #tpu.memory_space<vmem>>, vector<1x128xf32>,
    %c0_13 = arith.constant 0 : index
    %c0_14 = arith.constant 0 : index
    %20 = vector.load %arg7[%c0_13, %c0_14] : memref<1x128xf32, #tpu.memory_space<vmem>>, vector<1x128xf32>
    %cst_15 = arith.constant dense<0.000000e+00> : vector<128xf32>
    %21 = vector.multi_reduction <add>, %13, %cst_15 [0] : vector<8x128xf32> to vector<128xf32>
    %22 = vector.shape_cast %21 : vector<128xf32> to vector<1x128xf32>
    %23 = arith.addf %20, %22 : vector<1x128xf32>
    %c0_16 = arith.constant 0 : index
    %c0_17 = arith.constant 0 : index
    %24 = vector.load %arg7[%c0_16, %c0_17] : memref<1x128xf32, #tpu.memory_space<vmem>>, vector<1x128xf32>
    tpu.vector_store %arg7[%c0_16, %c0_17], %23 {strides = array<i32>} : memref<1x128xf32, #tpu.memory_space<vmem>>, vector<1x128xf32>,
    %c0_18 = arith.constant 0 : index
    %c0_19 = arith.constant 0 : index
    %25 = vector.load %arg8[%c0_18, %c0_19] : memref<1x128xf32, #tpu.memory_space<vmem>>, vector<1x128xf32>
    %cst_20 = arith.constant dense<0.000000e+00> : vector<128xf32>
    %26 = vector.multi_reduction <add>, %6, %cst_20 [0] : vector<8x128xf32> to vector<128xf32>
    %27 = vector.shape_cast %26 : vector<128xf32> to vector<1x128xf32>
    %28 = arith.addf %25, %27 : vector<1x128xf32>
    %c0_21 = arith.constant 0 : index
    %c0_22 = arith.constant 0 : index
    %29 = vector.load %arg8[%c0_21, %c0_22] : memref<1x128xf32, #tpu.memory_space<vmem>>, vector<1x128xf32>
    tpu.vector_store %arg8[%c0_21, %c0_22], %28 {strides = array<i32>} : memref<1x128xf32, #tpu.memory_space<vmem>>, vector<1x128xf32>,
    %c0_i32_23 = arith.constant 0 : i32
    %30 = arith.cmpi eq, %arg2, %c0_i32_23 : i32
    %31 = arith.extui %30 : i1 to i32
    %c0_i32_24 = arith.constant 0 : i32
    %32 = arith.cmpi ne, %31, %c0_i32_24 : i32
    scf.if %32 {
      %c0_25 = arith.constant 0 : index
      %c0_26 = arith.constant 0 : index
      %33 = vector.load %arg6[%c0_25, %c0_26] : memref<1x128xf32, #tpu.memory_space<vmem>>, vector<1x128xf32>
      %c0_27 = arith.constant 0 : index
      %c0_28 = arith.constant 0 : index
      %34 = vector.load %arg7[%c0_27, %c0_28] : memref<1x128xf32, #tpu.memory_space<vmem>>, vector<1x128xf32>
      %c0_29 = arith.constant 0 : index
      %c0_30 = arith.constant 0 : index
      %35 = vector.load %arg8[%c0_29, %c0_30] : memref<1x128xf32, #tpu.memory_space<vmem>>, vector<1x128xf32>
      %cst_31 = arith.constant 0.000000e+00 : f32
      %36 = vector.broadcast %cst_31 : f32 to vector<5x128xf32>
      %37 = tpu.concatenate %33, %34, %35, %36 in 0 : vector<1x128xf32>, vector<1x128xf32>, vector<1x128xf32>, vector<5x128xf32> -> vector<8x128xf32>
      %38 = vector.shape_cast %37 : vector<8x128xf32> to vector<1x1x8x128xf32>
      %c0_32 = arith.constant 0 : index
      %c0_33 = arith.constant 0 : index
      %c0_34 = arith.constant 0 : index
      %c0_35 = arith.constant 0 : index
      %39 = vector.load %arg5[%c0_32, %c0_33, %c0_34, %c0_35] : memref<1x1x8x128xf32, #tpu.memory_space<vmem>>, vector<1x1x8x128xf32>
      tpu.vector_store %arg5[%c0_32, %c0_33, %c0_34, %c0_35], %38 {strides = array<i32>} : memref<1x1x8x128xf32, #tpu.memory_space<vmem>>, vector<1x1x8x128xf32>,
    } else {
    }
    return
  }
  func.func @transform_0(%arg0: i32, %arg1: i32, %arg2: i32) -> (i32, i32, i32) {
    %c1_i32 = arith.constant 1 : i32
    %0 = arith.muli %arg1, %c1_i32 : i32
    %1 = arith.addi %0, %arg2 : i32
    %c0_i32 = arith.constant 0 : i32
    %c0_i32_0 = arith.constant 0 : i32
    return %arg0, %1, %c0_i32 : i32, i32, i32
  }
  func.func @transform_1(%arg0: i32, %arg1: i32, %arg2: i32) -> (i32, i32, i32) {
    %c1_i32 = arith.constant 1 : i32
    %0 = arith.muli %arg1, %c1_i32 : i32
    %1 = arith.addi %0, %arg2 : i32
    %c0_i32 = arith.constant 0 : i32
    %c0_i32_0 = arith.constant 0 : i32
    return %arg0, %1, %c0_i32 : i32, i32, i32
  }
  func.func @transform_2(%arg0: i32, %arg1: i32, %arg2: i32) -> (i32, i32, i32, i32) {
    %c0_i32 = arith.constant 0 : i32
    %c0_i32_0 = arith.constant 0 : i32
    %c0_i32_1 = arith.constant 0 : i32
    return %arg0, %arg1, %c0_i32, %c0_i32_0 : i32, i32, i32, i32
  }
}

</mosaic_0001>

<bundles_post_ra>
// kernel: tpu_custom_call.1
= control target key start
LH: loop header
LB: loop body
LE: loop exit
PB: predicated region body
PF: predicated region fallthrough
CT: control target
= control target key end

     0   :  { %7 = vsyncpa [#allocation6], 0  ;;  %s901_s0 = inlined_call_operand.hbm [shape: f32[2,8,128], index: 0, kind: input, shape index: {}]   ;;  %s902_s1 = inlined_call_operand.hbm [shape: f32[2,8,128], index: 1, kind: input, shape index: {}]   ;;  %s903_s2 = inlined_call_operand.hbm [shape: f32[2,1,8,128], index: 2, kind: output, shape index: {}]  }
   0x1   :  { %9 = vsyncpa [#allocation6 + $0x1], 0 }
   0x2   :  { %10 = vsyncpa [#allocation9], 0 }
   0x3   :  { %12 = vsyncpa [#allocation9 + $0x1], 0 }
   0x4   :  { %13 = vsyncpa [#allocation7], 0 }
   0x5   :  { %15 = vsyncpa [#allocation7 + $0x1], 0  ;;  %s676_s9 = smov 0   ;;  %s678_s10 = smov 0  }
   0x6   :  { %s680_s11 = smov 0   ;;  %s682_s12 = smov 0  }
   0x7   :  { %s684_s13 = smov 0   ;;  %s686_s14 = smov 0  }
   0x8 LB: > { %s421_s15 = sadd.s32 4294967295, %s655_s14   ;;  %s422_s16 = sadd.s32 4294967294, %s655_s14   ;;  %s655_s14 = sphi %s686_s14, %s21_s14   ;;  %s651_s13 = sphi %s684_s13, %s923_s13   ;;  %s647_s12 = sphi %s682_s12, %s922_s12   ;;  %s643_s11 = sphi %s680_s11, %s921_s11   ;;  %s639_s10 = sphi %s678_s10, %s920_s10   ;;  %s635_s9 = sphi %s676_s9, %s919_s9  }
   0x9   : > { %s40_s17 = sadd.s32 1, %s651_s13  ;;  %s51_s18 = sadd.s32 1, %s643_s11 }
   0xa   : > { %p42_p0 = scmp.ge.s32.totalorder %s40_s17, 2  ;;  %p58_p1 = scmp.ne.s32.totalorder %s643_s11, %s639_s10 }
   0xb   : > { %p59_p2 = scmp.eq.s32.totalorder %s655_s14, 0  ;;  %p64_p3 = scmp.ne.s32.totalorder %s639_s10, %s635_s9 }
   0xc   : > { %s925_s17 = smov (%p42_p0, %s40_s17), 0  ;;  %p65_p5 = scmp.eq.s32.totalorder %s421_s15, 0 }
   0xd   : > { %p717_p4 = por %p59_p2, %p58_p1  ;;  %s46_s20 = ssub.s32 %s651_s13, %s925_s17 }
   0xe   : > { %p120_p6 = scmp.eq.s32.totalorder %s421_s15, 1  ;;  %p49_p7 = scmp.eq.s32.totalorder %s46_s20, 0 }
   0xf   : > { %p723_p8 = por %p65_p5, %p64_p3  ;;  %p126_p10 = scmp.eq.s32.totalorder %s422_s16, 1 }
  0x10   : > { %p727_p9 = por %p120_p6, %p58_p1  ;;  %p456_p13 = scmp.lt.s32.totalorder %s655_s14, 2 }
  0x11   : > { %s907_s21 = scalar_select %p723_p8, 1, 0 }
  0x12   : > { %s908_s22 = scalar_select %p727_p9, 1, 0 }
  0x13   : > { %s732_s23 = scalar_select %p49_p7, %s643_s11, %s51_s18  }
  0x14   : > { %p734_p11 = por %p126_p10, %p64_p3  ;;  %s741_s25 = sand.u32 1, %s643_s11  }
  0x15   : > { %s425_s26 = sshll.u32 %s741_s25, 3  ;;  %s426_s27 = sshll.u32 %s651_s13, 7 }
  0x16   : > { %s909_s24 = scalar_select %p734_p11, 1, 0 }
  0x17   : > { %s750_s30 = scalar_lea.hbm %s901_s0, %s426_s27  ;;  %s150_s3 = scalar_lea.vmem [#allocation5], %s425_s26 }
  0x18   : > { %s159_s4 = sshll.u32 %s150_s3, 4  ;;  %p758_p0 = pnand %p456_p13, %p717_p4  ;;  %s754_s4 = int_to_ptr.vmem [resolvable:$true] %s159_s4 }
  0x19   : > { %s147_s6 = scalar_lea.sflag [#allocation6], %s741_s25  ;;  %s509_s7 = scalar_lea.hbm %s750_s30, 128 }
  0x1a   : > { %p510_p3 = scmp.ne.s32.totalorder %s750_s30, %s509_s7  ;;  %p511_p5 = pneg %p758_p0 }
  0x1b   : > { %s514_s16 = scalar_lea.hbm %s901_s0, 256  ;;  %p515_p4 = scmp.lt.u32.totalorder %s750_s30, %s901_s0 }
  0x1c   : > { %p512_p6 = pnand %p511_p5, %p510_p3  ;;  %p516_p10 = scmp.lt.u32.totalorder %s514_s16, %s509_s7 }
  0x1d   : > { %p518_p12 = scmp.lt.u32.totalorder %s509_s7, %s750_s30 }
  0x1e   : > { %p513_p7 = pneg %p512_p6  ;;  %p517_p13 = por %p516_p10, %p515_p4 }
  0x20   : > { %p519_p1 = por %p518_p12, %p517_p13 }
  0x22   : > { %p520_p2 = pnand %p519_p1, %p513_p7 }
  0x24   : > { %523 = shalt.err (!%p520_p2)
}
  0x25   : > { %s524_s20 = scalar_lea.vmem %s754_s4, 128  ;;  %s657_s28 = smov [#allocation5]  }
  0x26   : > { %p525_p3 = scmp.ne.s32.totalorder %s754_s4, %s524_s20  ;;  %s529_s29 = sshll.u32 %s657_s28, 4  ;;  %s530_s29 = int_to_ptr.vmem [resolvable:$false] %s529_s29 }
  0x27   : > { %s531_s3 = scalar_lea.vmem %s530_s29, 256  ;;  %p532_p9 = scmp.lt.s32.totalorder %s754_s4, %s530_s29 }
  0x28   : > { %p527_p6 = pnand %p525_p3, %p511_p5  ;;  %p533_p4 = scmp.lt.s32.totalorder %s531_s3, %s524_s20 }
  0x2a   : > { %p528_p11 = pneg %p527_p6  ;;  %p534_p10 = por %p533_p4, %p532_p9 }
  0x2c   : > { %p535_p12 = pnand %p534_p10, %p528_p11 }
  0x2e   : > { %538 = shalt.err (!%p535_p12)
}
  0x2f   : > { %448 = dma.hbm_to_vmem [thread:$0]  (!%p758_p0), %s750_s30, 128, %s754_s4, %s147_s6  }
  0x30   : > { %p911_p1 = scmp.lt.s32.totalorder %s655_s14, 3  ;;  %p912_p2 = scmp.ge.s32.totalorder %s655_s14, 1 }
  0x31   : > { %s803_s16 = scalar_lea.hbm %s902_s1, %s426_s27  ;;  %s170_s18 = scalar_lea.vmem [#allocation8], %s425_s26 }
  0x32   : > { %p794_p7 = pnand %p912_p2, %p911_p1  ;;  %s179_s19 = sshll.u32 %s170_s18, 4  ;;  %s180_s19 = int_to_ptr.vmem [resolvable:$true] %s179_s19 }
  0x33   : > { %s167_s30 = scalar_lea.sflag [#allocation9], %s741_s25  ;;  %s539_s4 = scalar_lea.hbm %s803_s16, 128 }
  0x34   : > { %s913_s7 = scalar_select %p794_p7, 1, 0 }
  0x35   : > { %p540_p9 = scmp.ne.s32.totalorder %s803_s16, %s539_s4  ;;  %s544_s27 = scalar_lea.hbm %s902_s1, 256 }
  0x36   : > { %p545_p3 = scmp.lt.u32.totalorder %s803_s16, %s902_s1  ;;  %p546_p6 = scmp.lt.u32.totalorder %s544_s27, %s539_s4 }
  0x37   : > { %p542_p11 = pnand %p540_p9, %p511_p5  ;;  %p548_p10 = scmp.lt.u32.totalorder %s539_s4, %s803_s16 }
  0x38   : > { %p547_p4 = por %p546_p6, %p545_p3 }
  0x39   : > { %p543_p13 = pneg %p542_p11 }
  0x3a   : > { %p549_p12 = por %p548_p10, %p547_p4 }
  0x3c   : > { %p550_p1 = pnand %p549_p12, %p543_p13 }
  0x3e   : > { %553 = shalt.err (!%p550_p1)
}
  0x3f   : > { %s554_s25 = scalar_lea.vmem %s180_s19, 128  ;;  %s658_s26 = smov [#allocation8]  }
  0x40   : > { %p555_p2 = scmp.ne.s32.totalorder %s180_s19, %s554_s25  ;;  %s559_s3 = sshll.u32 %s658_s26, 4  ;;  %s560_s3 = int_to_ptr.vmem [resolvable:$false] %s559_s3 }
  0x41   : > { %s561_s8 = scalar_lea.vmem %s560_s3, 256  ;;  %p562_p8 = scmp.lt.s32.totalorder %s180_s19, %s560_s3 }
  0x42   : > { %p557_p9 = pnand %p555_p2, %p511_p5  ;;  %p563_p7 = scmp.lt.s32.totalorder %s561_s8, %s554_s25 }
  0x44   : > { %p558_p11 = pneg %p557_p9  ;;  %p564_p3 = por %p563_p7, %p562_p8 }
  0x46   : > { %p565_p6 = pnand %p564_p3, %p558_p11 }
  0x48   : > { %568 = shalt.err (!%p565_p6)
}
  0x49   : > { %451 = dma.hbm_to_vmem [thread:$0]  (!%p758_p0), %s803_s16, 128, %s180_s19, %s167_s30  }
  0x4a   : > { %p914_p13 = scmp.ne.s32.totalorder %s913_s7, 0 }
  0x4b   : > { %s830_s15 = sand.u32 (!%p914_p13), 1, %s639_s10   ;;  %p915_p8 = scmp.ne.s32.totalorder (!%p914_p13), %s907_s21, 0 }
  0x4c   : > { %188 = sbr.rel (%p914_p13) target bundleno = 145 (0x91), region = 28  ;;  %s833_s18 = sshll.u32 (!%p914_p13), %s830_s15, 3 }
  0x4d   : > { %s191_s4 = scalar_lea.sflag (!%p914_p13), [#allocation6], %s830_s15  ;;  %s194_s6 = scalar_lea.vmem (!%p914_p13), [#allocation5], %s833_s18 }
  0x53   : > { %622 = dma.done.wait (%p915_p8), %s191_s4, 128  }
  0x54   : > { %624 = vsyncadd (%p915_p8), %s191_s4, 4294967168  ;;  %s200_s5 = scalar_lea.sflag [#allocation9], %s830_s15  ;;  %s203_s7 = scalar_lea.vmem [#allocation8], %s833_s18 }
  0x55   : > { %626 = dma.done.wait (%p915_p8), %s200_s5, 128  }
  0x56   : > { %628 = vsyncadd (%p915_p8), %s200_s5, 4294967168  ;;  %v659_v0 = vmov 0.0   ;;  %v238_v1 = vld [vmem:[%s194_s6] sm:$0xff]  ;;  %v239_v2 = vld [vmem:[%s203_s7] sm:$0xff]  ;;  %vm290_vm0 = vcmask 1040384   ;;  %vm292_vm1 = vcmask 1041408  }
  0x57   : > { %235 = vst [vmem:[#allocation2] sm:$0x1] %v659_v0  ;;  %236 = vst [vmem:[#allocation3] sm:$0x1] %v659_v0  ;;  %v240_v3 = vmul.f32 0.5, %v238_v1  ;;  %v264_v4 = vrot.slane %v239_v2, 4 }
  0x58   : > { %237 = vst [vmem:[#allocation4] sm:$0x1] %v659_v0  ;;  %s228_s21 = scalar_lea.vmem [#allocation10], %s833_s18  ;;  %s436_s19 = sshll.u32 %s647_s12, 7  ;;  %vm294_vm2 = vcmask 1042432  }
  0x59   : > { %507 = vtanh.f32 %v240_v3  ;;  %v265_v5 = vadd.f32 %v264_v4, %v239_v2  ;;  %s312_s16 = sshll.u32 %s228_s21, 4  ;;  %s854_s27 = scalar_lea.hbm %s903_s2, %s436_s19  ;;  %s849_s16 = int_to_ptr.vmem [resolvable:$true] %s312_s16 }
  0x5a   : > { %s298_s28 = scalar_lea.sflag [#allocation7], %s830_s15  ;;  %s569_s29 = scalar_lea.vmem %s849_s16, 128 }
  0x5b   : > { %v266_v6 = vrot.slane %v265_v5, 2  ;;  %p570_p0 = scmp.ne.s32.totalorder %s849_s16, %s569_s29  ;;  %p916_p5 = scmp.ne.s32.totalorder %s908_s22, 0 }
  0x5c   : > { %s660_s12 = smov [#allocation10]  }
  0x5d   : > { %v267_v7 = vadd.f32 %v266_v6, %v265_v5  ;;  %p571_p7 = pnand %p570_p0, %p916_p5  ;;  %s573_s25 = sshll.u32 %s660_s12, 4  ;;  %s574_s25 = int_to_ptr.vmem [resolvable:$false] %s573_s25 }
  0x5e   : > { %v254_v25 = vld [vmem:[#allocation3] sm:$0x1]  ;;  %v244_v28 = vld [vmem:[#allocation2] sm:$0x1]  ;;  %s575_s26 = scalar_lea.vmem %s574_s25, 256  ;;  %p576_p10 = scmp.lt.s32.totalorder %s849_s16, %s574_s25 }
  0x5f   : > { %v268_v8 = vrot.slane %v267_v7, 1  ;;  %v263_v9 = vld [vmem:[#allocation4] sm:$0x1]  ;;  %p572_p4 = pneg %p571_p7  ;;  %p577_p12 = scmp.lt.s32.totalorder %s575_s26, %s569_s29 }
  0x61   : > { %v269_v10 = vadd.f32 %v268_v8, %v267_v7  ;;  %p578_p1 = por %p577_p12, %p576_p10 }
  0x63   : > { %v508_v11 = vpop.eup %507  ;;  %v270_v12 = vadd.f32 %v269_v10, %v263_v9  ;;  %p579_p2 = pnand %p578_p1, %p572_p4 }
  0x64   : > { %v242_v13 = vadd.f32 1.0, %v508_v11 }
  0x65   : > { %271 = vst [vmem:[#allocation4] sm:$0x1] %v270_v12 }
  0x66   : > { %v243_v14 = vmul.f32 0.5, %v242_v13 }
  0x68   : > { %v245_v15 = vmul.f32 %v243_v14, %v239_v2  ;;  %v255_v16 = vrot.slane %v243_v14, 4 }
  0x6a   : > { %v246_v17 = vrot.slane %v245_v15, 4  ;;  %v256_v18 = vadd.f32 %v255_v16, %v243_v14 }
  0x6c   : > { %v247_v19 = vadd.f32 %v246_v17, %v245_v15  ;;  %v257_v20 = vrot.slane %v256_v18, 2  ;;  %v434_v33 = vld [vmem:[#allocation4] ss:$0 sm:$0xff] }
  0x6e   : > { %v248_v21 = vrot.slane %v247_v19, 2  ;;  %v258_v22 = vadd.f32 %v257_v20, %v256_v18 }
  0x70   : > { %v249_v23 = vadd.f32 %v248_v21, %v247_v19  ;;  %v259_v24 = vrot.slane %v258_v22, 1 }
  0x72   : > { %v250_v26 = vrot.slane %v249_v23, 1  ;;  %v260_v27 = vadd.f32 %v259_v24, %v258_v22 }
  0x74   : > { %v251_v29 = vadd.f32 %v250_v26, %v249_v23  ;;  %v261_v30 = vadd.f32 %v260_v27, %v254_v25 }
  0x76   : > { %v252_v31 = vadd.f32 %v251_v29, %v244_v28  ;;  %262 = vst [vmem:[#allocation3] sm:$0x1] %v261_v30 }
  0x78   : > { %253 = vst [vmem:[#allocation2] sm:$0x1] %v252_v31 }
  0x7d   : > { %v433_v32 = vld [vmem:[#allocation3] ss:$0 sm:$0xff] }
  0x7f   : > { %v275_v34 = vld [vmem:[#allocation2] sm:$0x1] }
  0x80   : > { %v291_v35 = vsel %vm290_vm0, %v275_v34, %v433_v32 }
  0x81   : > { %v293_v36 = vsel %vm292_vm1, %v291_v35, %v434_v33 }
  0x82   : > { %v295_v37 = vsel %vm294_vm2, %v293_v36, 0.0 }
  0x83   : > { %296 = vst [vmem:[%s228_s21] sm:$0xff] %v295_v37 }
  0x84   : > { %582 = shalt.err (!%p579_p2)
}
  0x85   : > { %s583_s3 = scalar_lea.hbm %s854_s27, 128  ;;  %s587_s18 = scalar_lea.hbm %s903_s2, 256 }
  0x86   : > { %p584_p9 = scmp.ne.s32.totalorder %s854_s27, %s583_s3  ;;  %p588_p6 = scmp.lt.u32.totalorder %s854_s27, %s903_s2 }
  0x87   : > { %p589_p13 = scmp.lt.u32.totalorder %s587_s18, %s583_s3  ;;  %p591_p0 = scmp.lt.u32.totalorder %s583_s3, %s854_s27 }
  0x88   : > { %p585_p11 = pnand %p584_p9, %p916_p5 }
  0x89   : > { %p590_p8 = por %p589_p13, %p588_p6 }
  0x8a   : > { %p586_p3 = pneg %p585_p11 }
  0x8b   : > { %p592_p7 = por %p591_p0, %p590_p8 }
  0x8d   : > { %p593_p4 = pnand %p592_p7, %p586_p3 }
  0x8f   : > { %596 = shalt.err (!%p593_p4)
}
  0x90   : > { %443 = dma.vmem_to_hbm [thread:$0]  (%p916_p5), %s849_s16, 128, %s854_s27, %s298_s28  }
  0x91 PF: > { %s324_s5 = sand.u32 1, %s635_s9   ;;  %p917_p10 = scmp.ne.s32.totalorder %s909_s24, 0 }
  0x92   : > { %p918_p12 = scmp.ge.s32.totalorder %s655_s14, 2  ;;  %s325_s7 = scalar_lea.sflag [#allocation7], %s324_s5 }
  0x94   : > { %p453_p1 = pnand %p918_p12, %p917_p10 }
  0x96   : > { %630 = dma.done.wait (!%p453_p1), %s325_s7, 128  }
  0x97   : > { %632 = vsyncadd (!%p453_p1), %s325_s7, 4294967168  ;;  %s21_s14 = sadd.s32 1, %s655_s14   ;;  %s919_s9 = smov %s639_s10 }
  0x98   : > { %p18_p2 = scmp.ge.s32.totalorder %s21_s14, 4   ;;  %s920_s10 = smov %s643_s11 }
  0x99   : > { %s921_s11 = smov %s732_s23  ;;  %s922_s12 = smov %s651_s13 }
  0x9a   : > { %s923_s13 = smov %s925_s17  ;;  %20 = sbr.rel (!%p18_p2) target bundleno = 8 (0x8), region = 94 }
  0xa1   :  { %330 = vsyncpa [#allocation6], 1 }
  0xa2   :  { %332 = vsyncpa [#allocation6 + $0x1], 1 }
  0xa3   :  { %333 = vsyncpa [#allocation9], 1 }
  0xa4   :  { %335 = vsyncpa [#allocation9 + $0x1], 1 }
  0xa5   :  { %336 = vsyncpa [#allocation7], 1 }
  0xa6   :  { %338 = vsyncpa [#allocation7 + $0x1], 1 }

</bundles_post_ra>
